<compile_context>
chip_gen: v7x
topology: tpu7x:2x2x1
jax: 0.10.0
libtpu: 0.0.40
codegen_flags: <defaults>
</compile_context>

<pallas_src>
import functools

import jax
import jax.numpy as jnp
from jax.experimental import pallas as pl
from jax.experimental.pallas import tpu as pltpu

BN_EPS = 1e-5
LANE = 128


def _round_up(n, m):
    return ((n + m - 1) // m) * m


def _pad2d(a, rows, cols):
    r, c = a.shape
    return jnp.pad(a, ((0, rows - r), (0, cols - c)))


# -----------------------------------------------------------------------------
# Tiled path, pass 1: per-feature sum and sum-of-squares over the full batch.
# Both outputs accumulate into the same (1, d_in) block across the batch grid
# axis ("arbitrary").  Zero-padded batch rows contribute 0 to both sums, so the
# statistics are exact for the real batch.
# -----------------------------------------------------------------------------
def bn_stats_kernel(x_ref, sum_ref, sumsq_ref):
    @pl.when(pl.program_id(0) == 0)
    def _():
        sum_ref[...] = jnp.zeros_like(sum_ref)
        sumsq_ref[...] = jnp.zeros_like(sumsq_ref)

    x = x_ref[...]                                   # f32 (tile_b, d_in)
    sum_ref[...] += jnp.sum(x, axis=0, keepdims=True)
    sumsq_ref[...] += jnp.sum(x * x, axis=0, keepdims=True)


# -----------------------------------------------------------------------------
# Tiled path, pass 2: BN is already folded into (w1_eff, b1_eff), so this is a
# pure 3-layer MLP on a bf16 X tile.  Weights arrive padded + bf16; biases f32.
# Output tile is lane-dense (padded out_dim) -> unmasked vector stores.
# -----------------------------------------------------------------------------
def mlp_kernel(x_ref, w1_ref, b1_ref, w2_ref, b2_ref, w3_ref, b3_ref, out_ref,
               *, epilogue_dtype):
    h1 = jnp.dot(x_ref[...], w1_ref[...],
                 preferred_element_type=jnp.float32) + b1_ref[...]
    h1 = jnp.maximum(h1, 0.0).astype(epilogue_dtype)

    h2 = jnp.dot(h1.astype(jnp.bfloat16), w2_ref[...],
                 preferred_element_type=jnp.float32) + b2_ref[...]
    h2 = jnp.maximum(h2, 0.0).astype(epilogue_dtype)

    out = jnp.dot(h2.astype(jnp.bfloat16), w3_ref[...],
                  preferred_element_type=jnp.float32) + b3_ref[...]
    out_ref[...] = out.astype(out_ref.dtype)


# -----------------------------------------------------------------------------
# Fused path: X is held in VMEM once; BN statistics, normalization and the MLP
# all run from that single copy (single HBM read of X).
# -----------------------------------------------------------------------------
def fused_mlp_kernel(x_ref, w1_ref, b1_ref, w2_ref, b2_ref, w3_ref, b3_ref,
                     out_ref, *, n_real, epilogue_dtype):
    x = x_ref[...]                                   # f32 (bp, d_in); rows >= n_real are 0
    n = jnp.float32(n_real)
    mean = jnp.sum(x, axis=0, keepdims=True) / n

    # Centered (numerically safer) biased variance; mask out padded rows so they
    # do not contribute (extra elementwise pass costs no HBM traffic here).
    row = jax.lax.broadcasted_iota(jnp.int32, x.shape, 0)
    d = jnp.where(row < n_real, x - mean, 0.0)
    var = jnp.sum(d * d, axis=0, keepdims=True) / n
    inv_std = jax.lax.rsqrt(var + BN_EPS)

    xn = ((x - mean) * inv_std).astype(jnp.bfloat16)

    h1 = jnp.dot(xn, w1_ref[...],
                 preferred_element_type=jnp.float32) + b1_ref[...]
    h1 = jnp.maximum(h1, 0.0).astype(epilogue_dtype)

    h2 = jnp.dot(h1.astype(jnp.bfloat16), w2_ref[...],
                 preferred_element_type=jnp.float32) + b2_ref[...]
    h2 = jnp.maximum(h2, 0.0).astype(epilogue_dtype)

    out = jnp.dot(h2.astype(jnp.bfloat16), w3_ref[...],
                  preferred_element_type=jnp.float32) + b3_ref[...]
    out_ref[...] = out.astype(out_ref.dtype)


def _fused_vmem_bytes(bp, d_in, hp, op):
    x = bp * d_in * 4
    w = (d_in * hp + hp * hp + hp * op) * 2
    b = (hp + hp + op) * 4
    inter = 2 * bp * hp * 4          # f32 h1/h2 intermediates
    out = bp * op * 4
    return x + w + b + inter + out


@functools.partial(
    jax.jit,
    static_argnames=("tile_b", "force_tiled", "bf16_epilogue", "fused_vmem_budget"))
def mlp_forward(x, w1, b1, w2, b2, w3, b3, *, tile_b=512, force_tiled=False,
                bf16_epilogue=False, fused_vmem_budget=8 * 1024 * 1024):
    """x: (B, D_in) f32; w*: (in, out) f32; b*: (out,) f32. Returns (B, out_dim) f32."""
    batch, d_in = x.shape
    hidden = w1.shape[1]
    out_dim = w3.shape[1]

    hp = _round_up(hidden, LANE)
    op = _round_up(out_dim, LANE)
    epilogue_dtype = jnp.bfloat16 if bf16_epilogue else jnp.float32

    # Weights/biases padded to lane width once (hidden/out only; d_in stays raw).
    w1f = _pad2d(w1.astype(jnp.float32), d_in, hp)          # f32 copy kept for BN fold
    w2p = _pad2d(w2.astype(jnp.float32), hp, hp).astype(jnp.bfloat16)
    w3p = _pad2d(w3.astype(jnp.float32), hp, op).astype(jnp.bfloat16)
    b1p = _pad2d(b1.reshape(1, -1).astype(jnp.float32), 1, hp)
    b2p = _pad2d(b2.reshape(1, -1).astype(jnp.float32), 1, hp)
    b3p = _pad2d(b3.reshape(1, -1).astype(jnp.float32), 1, op)
    xf32 = x.astype(jnp.float32)

    # ---- Fused single-call path: everything resident in VMEM, X read once.
    bp_fused = _round_up(batch, 16)
    use_fused = (not force_tiled) and (
        _fused_vmem_bytes(bp_fused, d_in, hp, op) <= fused_vmem_budget)

    if use_fused:
        xp = jnp.pad(xf32, ((0, bp_fused - batch), (0, 0)))
        out_p = pl.pallas_call(
            functools.partial(fused_mlp_kernel, n_real=batch,
                              epilogue_dtype=epilogue_dtype),
            out_shape=jax.ShapeDtypeStruct((bp_fused, op), jnp.float32),
            compiler_params=pltpu.CompilerParams(
                vmem_limit_bytes=32 * 1024 * 1024),
        )(xp, w1f.astype(jnp.bfloat16), b1p, w2p, b2p, w3p, b3p)
        return out_p[:batch, :out_dim]

    # ---- Tiled two-pass path.
    tile_b = min(_round_up(tile_b, 16), _round_up(batch, 16))
    bp = _round_up(batch, tile_b)
    nb = bp // tile_b
    xp32 = jnp.pad(xf32, ((0, bp - batch), (0, 0)))

    # Pass 1: exact full-batch BN statistics (single f32 read of X).
    s, sq = pl.pallas_call(
        bn_stats_kernel,
        out_shape=(jax.ShapeDtypeStruct((1, d_in), jnp.float32),
                   jax.ShapeDtypeStruct((1, d_in), jnp.float32)),
        grid=(nb,),
        in_specs=[pl.BlockSpec((tile_b, d_in), lambda i: (i, 0))],
        out_specs=(pl.BlockSpec((1, d_in), lambda i: (0, 0)),
                   pl.BlockSpec((1, d_in), lambda i: (0, 0))),
        compiler_params=pltpu.CompilerParams(
            dimension_semantics=("arbitrary",)),
    )(xp32)

    n = jnp.float32(batch)
    mean = s / n
    var = jnp.maximum(sq / n - mean * mean, 0.0)   # biased variance (training mode), clamped
    inv_std = jax.lax.rsqrt(var + BN_EPS)

    # Fold BatchNorm into fc1 (tiny (d_in, hp) op in the wrapper, f32 then bf16).
    w1_eff = (w1f * inv_std.reshape(d_in, 1)).astype(jnp.bfloat16)
    b1_eff = b1p - (mean * inv_std) @ w1f

    # Pass 2: stream X as bf16; weights/biases VMEM-resident; "parallel" batch axis.
    xbf = jnp.pad(x.astype(jnp.bfloat16), ((0, bp - batch), (0, 0)))
    out_p = pl.pallas_call(
        functools.partial(mlp_kernel, epilogue_dtype=epilogue_dtype),
        out_shape=jax.ShapeDtypeStruct((bp, op), jnp.float32),
        grid=(nb,),
        in_specs=[
            pl.BlockSpec((tile_b, d_in), lambda i: (i, 0)),   # x tile (streams, bf16)
            pl.BlockSpec((d_in, hp), lambda i: (0, 0)),       # w1_eff (resident)
            pl.BlockSpec((1, hp), lambda i: (0, 0)),          # b1_eff
            pl.BlockSpec((hp, hp), lambda i: (0, 0)),         # w2
            pl.BlockSpec((1, hp), lambda i: (0, 0)),          # b2
            pl.BlockSpec((hp, op), lambda i: (0, 0)),         # w3
            pl.BlockSpec((1, op), lambda i: (0, 0)),          # b3
        ],
        out_specs=pl.BlockSpec((tile_b, op), lambda i: (i, 0)),
        compiler_params=pltpu.CompilerParams(
            dimension_semantics=("parallel",)),
    )(xbf, w1_eff, b1_eff, w2p, b2p, w3p, b3p)

    return out_p[:batch, :out_dim]


def init_linear(key, fan_in, fan_out):
    """PyTorch nn.Linear default init: U(-1/sqrt(fan_in), 1/sqrt(fan_in))."""
    kw, kb = jax.random.split(key)
    bound = 1.0 / jnp.sqrt(fan_in)
    # stored as (in, out) so kernel multiplies x @ W  (== x @ W_pt.T)
    w = jax.random.uniform(kw, (fan_in, fan_out), jnp.float32, -bound, bound)
    b = jax.random.uniform(kb, (fan_out,), jnp.float32, -bound, bound)
    return w, b


def reference_forward_f32(x, w1, b1, w2, b2, w3, b3):
    """Faithful f32 reference of the PyTorch forward (training-mode BN)."""
    mean = jnp.mean(x, axis=0, keepdims=True)
    var = jnp.mean((x - mean) ** 2, axis=0, keepdims=True)
    xn = (x - mean) / jnp.sqrt(var + BN_EPS)
    h1 = jnp.maximum(xn @ w1 + b1.reshape(1, -1), 0.0)
    h2 = jnp.maximum(h1 @ w2 + b2.reshape(1, -1), 0.0)
    return h2 @ w3 + b3.reshape(1, -1)


if __name__ == "__main__":
    # Shapes consistent with the module: input_dim=16, hidden_dim=64 (default),
    # out_dim=8.
    input_dim, hidden_dim, out_dim = 16, 64, 8

    key = jax.random.PRNGKey(0)
    kx, k1, k2, k3 = jax.random.split(key, 4)

    w1, b1 = init_linear(k1, input_dim, hidden_dim)
    w2, b2 = init_linear(k2, hidden_dim, hidden_dim)
    w3, b3 = init_linear(k3, hidden_dim, out_dim)

    # 1) Small batch -> fused single-call path (X read from HBM exactly once).
    batch_a = 256
    xa = jax.random.normal(kx, (batch_a, input_dim), jnp.float32)
    out_a = mlp_forward(xa, w1, b1, w2, b2, w3, b3)
    jax.block_until_ready(out_a)
    assert out_a.shape == (batch_a, out_dim)
    ref_a = reference_forward_f32(xa, w1, b1, w2, b2, w3, b3)
    assert jnp.allclose(out_a, ref_a, atol=5e-2, rtol=5e-2), "fused path mismatch"

    # 2) Forced tiled two-pass path.  batch=400 with tile_b=128 gives 4 grid
    #    blocks and 112 zero-padded rows (exercises accumulation + padding).
    batch_b = 400
    xb = jax.random.normal(jax.random.fold_in(kx, 1), (batch_b, input_dim),
                           jnp.float32)
    out_b = mlp_forward(xb, w1, b1, w2, b2, w3, b3,
                        tile_b=128, force_tiled=True, bf16_epilogue=True)
    jax.block_until_ready(out_b)
    assert out_b.shape == (batch_b, out_dim)
    ref_b = reference_forward_f32(xb, w1, b1, w2, b2, w3, b3)
    assert jnp.allclose(out_b, ref_b, atol=5e-2, rtol=5e-2), "tiled path mismatch"

    print("KERNEL_OK")
</pallas_src>

<mosaic_0001>
module attributes {stable_mosaic.version = 11 : i64} {
  func.func @fused_mlp_kernel(%arg0: memref<256x16xf32, #tpu.memory_space<vmem>>, %arg1: memref<16x128xbf16, #tpu.memory_space<vmem>>, %arg2: memref<1x128xf32, #tpu.memory_space<vmem>>, %arg3: memref<128x128xbf16, #tpu.memory_space<vmem>>, %arg4: memref<1x128xf32, #tpu.memory_space<vmem>>, %arg5: memref<128x128xbf16, #tpu.memory_space<vmem>>, %arg6: memref<1x128xf32, #tpu.memory_space<vmem>>, %arg7: memref<256x128xf32, #tpu.memory_space<vmem>>) attributes {dimension_semantics = [], scalar_prefetch = 0 : i64, scratch_operands = 0 : i64, tpu.core_type = #tpu.core_type<tc>} {
    %c0 = arith.constant 0 : index
    %c0_0 = arith.constant 0 : index
    %0 = vector.load %arg0[%c0, %c0_0] : memref<256x16xf32, #tpu.memory_space<vmem>>, vector<256x16xf32>
    %cst = arith.constant dense<0.000000e+00> : vector<16xf32>
    %1 = vector.multi_reduction <add>, %0, %cst [0] : vector<256x16xf32> to vector<16xf32>
    %2 = vector.shape_cast %1 : vector<16xf32> to vector<1x16xf32>
    %cst_1 = arith.constant 2.560000e+02 : f32
    %3 = vector.broadcast %cst_1 : f32 to vector<1x16xf32>
    %4 = arith.divf %2, %3 : vector<1x16xf32>
    %5 = tpu.iota {dimensions = array<i32: 0>} : vector<256x16xi32>
    %c256_i32 = arith.constant 256 : i32
    %6 = vector.broadcast %c256_i32 : i32 to vector<256x16xi32>
    %7 = arith.cmpi slt, %5, %6 : vector<256x16xi32>
    %8 = vector.broadcast %4 : vector<1x16xf32> to vector<256x16xf32>
    %9 = arith.subf %0, %8 : vector<256x16xf32>
    %cst_2 = arith.constant 0.000000e+00 : f32
    %10 = vector.broadcast %cst_2 : f32 to vector<256x16xf32>
    %11 = arith.select %7, %9, %10 : vector<256x16xi1>, vector<256x16xf32>
    %12 = arith.mulf %11, %11 : vector<256x16xf32>
    %cst_3 = arith.constant dense<0.000000e+00> : vector<16xf32>
    %13 = vector.multi_reduction <add>, %12, %cst_3 [0] : vector<256x16xf32> to vector<16xf32>
    %14 = vector.shape_cast %13 : vector<16xf32> to vector<1x16xf32>
    %cst_4 = arith.constant 2.560000e+02 : f32
    %15 = vector.broadcast %cst_4 : f32 to vector<1x16xf32>
    %16 = arith.divf %14, %15 : vector<1x16xf32>
    %cst_5 = arith.constant 9.99999974E-6 : f32
    %17 = vector.broadcast %cst_5 : f32 to vector<1x16xf32>
    %18 = arith.addf %16, %17 : vector<1x16xf32>
    %19 = math.rsqrt %18 : vector<1x16xf32>
    %20 = vector.broadcast %4 : vector<1x16xf32> to vector<256x16xf32>
    %21 = arith.subf %0, %20 : vector<256x16xf32>
    %22 = vector.broadcast %19 : vector<1x16xf32> to vector<256x16xf32>
    %23 = arith.mulf %21, %22 : vector<256x16xf32>
    %24 = arith.truncf %23 : vector<256x16xf32> to vector<256x16xbf16>
    %c0_6 = arith.constant 0 : index
    %c0_7 = arith.constant 0 : index
    %25 = vector.load %arg1[%c0_6, %c0_7] : memref<16x128xbf16, #tpu.memory_space<vmem>>, vector<16x128xbf16>
    %cst_8 = arith.constant dense<0.000000e+00> : vector<256x128xf32>
    %26 = tpu.matmul %24, %25, %cst_8 {dimension_numbers = #tpu.dot_dimension_numbers<[1], [0], [0], [1], [0, 0, 1, 1], [], []>} : vector<256x16xbf16>, vector<16x128xbf16>, vector<256x128xf32> -> vector<256x128xf32>
    %c0_9 = arith.constant 0 : index
    %c0_10 = arith.constant 0 : index
    %27 = vector.load %arg2[%c0_9, %c0_10] : memref<1x128xf32, #tpu.memory_space<vmem>>, vector<1x128xf32>
    %28 = vector.broadcast %27 : vector<1x128xf32> to vector<256x128xf32>
    %29 = arith.addf %26, %28 : vector<256x128xf32>
    %cst_11 = arith.constant 0.000000e+00 : f32
    %30 = vector.broadcast %cst_11 : f32 to vector<256x128xf32>
    %31 = arith.maximumf %29, %30 : vector<256x128xf32>
    %32 = arith.truncf %31 : vector<256x128xf32> to vector<256x128xbf16>
    %c0_12 = arith.constant 0 : index
    %c0_13 = arith.constant 0 : index
    %33 = vector.load %arg3[%c0_12, %c0_13] : memref<128x128xbf16, #tpu.memory_space<vmem>>, vector<128x128xbf16>
    %cst_14 = arith.constant dense<0.000000e+00> : vector<256x128xf32>
    %34 = tpu.matmul %32, %33, %cst_14 {dimension_numbers = #tpu.dot_dimension_numbers<[1], [0], [0], [1], [0, 0, 1, 1], [], []>} : vector<256x128xbf16>, vector<128x128xbf16>, vector<256x128xf32> -> vector<256x128xf32>
    %c0_15 = arith.constant 0 : index
    %c0_16 = arith.constant 0 : index
    %35 = vector.load %arg4[%c0_15, %c0_16] : memref<1x128xf32, #tpu.memory_space<vmem>>, vector<1x128xf32>
    %36 = vector.broadcast %35 : vector<1x128xf32> to vector<256x128xf32>
    %37 = arith.addf %34, %36 : vector<256x128xf32>
    %cst_17 = arith.constant 0.000000e+00 : f32
    %38 = vector.broadcast %cst_17 : f32 to vector<256x128xf32>
    %39 = arith.maximumf %37, %38 : vector<256x128xf32>
    %40 = arith.truncf %39 : vector<256x128xf32> to vector<256x128xbf16>
    %c0_18 = arith.constant 0 : index
    %c0_19 = arith.constant 0 : index
    %41 = vector.load %arg5[%c0_18, %c0_19] : memref<128x128xbf16, #tpu.memory_space<vmem>>, vector<128x128xbf16>
    %cst_20 = arith.constant dense<0.000000e+00> : vector<256x128xf32>
    %42 = tpu.matmul %40, %41, %cst_20 {dimension_numbers = #tpu.dot_dimension_numbers<[1], [0], [0], [1], [0, 0, 1, 1], [], []>} : vector<256x128xbf16>, vector<128x128xbf16>, vector<256x128xf32> -> vector<256x128xf32>
    %c0_21 = arith.constant 0 : index
    %c0_22 = arith.constant 0 : index
    %43 = vector.load %arg6[%c0_21, %c0_22] : memref<1x128xf32, #tpu.memory_space<vmem>>, vector<1x128xf32>
    %44 = vector.broadcast %43 : vector<1x128xf32> to vector<256x128xf32>
    %45 = arith.addf %42, %44 : vector<256x128xf32>
    %c0_23 = arith.constant 0 : index
    %c0_24 = arith.constant 0 : index
    %46 = vector.load %arg7[%c0_23, %c0_24] : memref<256x128xf32, #tpu.memory_space<vmem>>, vector<256x128xf32>
    tpu.vector_store %arg7[%c0_23, %c0_24], %45 {strides = array<i32>} : memref<256x128xf32, #tpu.memory_space<vmem>>, vector<256x128xf32>,
    return
  }
}

</mosaic_0001>

<bundles_post_ra>
// kernel: mlp_forward.1
= control target key start
LH: loop header
LB: loop body
LE: loop exit
PB: predicated region body
PF: predicated region fallthrough
CT: control target
= control target key end

     0   :  { %vm59_vm0 = vcmask 130048   ;;  %s2324_s1 = inlined_call_operand.vmem [shape: bf16[16,128], index: 1, kind: input, shape index: {}]   ;;  %s2325_s0 = inlined_call_operand.vmem [shape: f32[256,16], index: 0, kind: input, shape index: {}]   ;;  %s2326_s3 = inlined_call_operand.vmem [shape: bf16[128,128], index: 3, kind: input, shape index: {}]   ;;  %s2327_s5 = inlined_call_operand.vmem [shape: bf16[128,128], index: 5, kind: input, shape index: {}]   ;;  %s2328_s2 = inlined_call_operand.vmem [shape: f32[1,128], index: 2, kind: input, shape index: {}]   ;;  %s2329_s4 = inlined_call_operand.vmem [shape: f32[1,128], index: 4, kind: input, shape index: {}]   ;;  %s2330_s6 = inlined_call_operand.vmem [shape: f32[1,128], index: 6, kind: input, shape index: {}]   ;;  %s2331_s7 = inlined_call_operand.vmem [shape: f32[256,128], index: 7, kind: output, shape index: {}]  }
   0x1   :  { %v1465_v0 = vld [vmem:[%s2324_s1] sm:$0xff]   ;;  %v1535_v2 = vld [vmem:[%s2325_s0 + $0x8] sm:$0xff]  ;;  %v1540_v3 = vld [vmem:[%s2325_s0 + $0x10] sm:$0xff] }
   0x2   :  { %v1530_v1 = vld [vmem:[%s2325_s0] sm:$0xff]  ;;  %1333 = vmatprep.subr.bf16.mxu0 %v1465_v0  ;;  %v1545_v4 = vld [vmem:[%s2325_s0 + $0x18] sm:$0xff]  ;;  %v61_v6 = vsel %vm59_vm0, %v1535_v2, 0.0  ;;  %v63_v7 = vsel %vm59_vm0, %v1540_v3, 0.0  ;;  %1463 = vmatprep.subr.bf16.mxu1 %v1465_v0  ;;  %v1563_v11 = vld [vmem:[%s2325_s0 + $0x28] sm:$0xff] }
   0x3   :  { %v60_v5 = vsel %vm59_vm0, %v1530_v1, 0.0  ;;  %1334 = vmatpush3.bf16.msra.mxu0 %v1465_v0  ;;  %v1556_v8 = vld [vmem:[%s2325_s0 + $0x20] sm:$0xff]  ;;  %1464 = vmatpush3.bf16.msra.mxu1 %v1465_v0  ;;  %v65_v10 = vsel %vm59_vm0, %v1545_v4, 0.0  ;;  %v1570_v14 = vld [vmem:[%s2325_s0 + $0x30] sm:$0xff]  ;;  %v69_v16 = vsel %vm59_vm0, %v1563_v11, 0.0  ;;  %v1577_v17 = vld [vmem:[%s2325_s0 + $0x38] sm:$0xff] }
   0x4   :  { %v62_v9 = vadd.f32 %v61_v6, %v60_v5  ;;  %v67_v13 = vsel %vm59_vm0, %v1556_v8, 0.0  ;;  %v71_v19 = vsel %vm59_vm0, %v1570_v14, 0.0  ;;  %v1584_v20 = vld [vmem:[%s2325_s0 + $0x40] sm:$0xff]  ;;  %v73_v22 = vsel %vm59_vm0, %v1577_v17, 0.0  ;;  %v1591_v23 = vld [vmem:[%s2325_s0 + $0x48] sm:$0xff]  ;;  %v1598_v26 = vld [vmem:[%s2325_s0 + $0x50] sm:$0xff] }
   0x5   :  { %v75_v25 = vsel %vm59_vm0, %v1584_v20, 0.0  ;;  %v77_v28 = vsel %vm59_vm0, %v1591_v23, 0.0  ;;  %v1605_v29 = vld [vmem:[%s2325_s0 + $0x58] sm:$0xff]  ;;  %v79_v31 = vsel %vm59_vm0, %v1598_v26, 0.0  ;;  %v1612_v32 = vld [vmem:[%s2325_s0 + $0x60] sm:$0xff]  ;;  %v1619_v35 = vld [vmem:[%s2325_s0 + $0x68] sm:$0xff] }
   0x6   :  { %v64_v12 = vadd.f32 %v63_v7, %v62_v9  ;;  %v81_v34 = vsel %vm59_vm0, %v1605_v29, 0.0  ;;  %v83_v37 = vsel %vm59_vm0, %v1612_v32, 0.0  ;;  %v1626_v38 = vld [vmem:[%s2325_s0 + $0x70] sm:$0xff]  ;;  %v85_v40 = vsel %vm59_vm0, %v1619_v35, 0.0  ;;  %v1633_v41 = vld [vmem:[%s2325_s0 + $0x78] sm:$0xff]  ;;  %v1640_v44 = vld [vmem:[%s2325_s0 + $0x80] sm:$0xff] }
   0x7   :  { %v87_v43 = vsel %vm59_vm0, %v1626_v38, 0.0  ;;  %v89_v46 = vsel %vm59_vm0, %v1633_v41, 0.0  ;;  %v1647_v47 = vld [vmem:[%s2325_s0 + $0x88] sm:$0xff]  ;;  %v91_v49 = vsel %vm59_vm0, %v1640_v44, 0.0  ;;  %v1654_v50 = vld [vmem:[%s2325_s0 + $0x90] sm:$0xff]  ;;  %v1661_v53 = vld [vmem:[%s2325_s0 + $0x98] sm:$0xff] }
   0x8   :  { %v66_v15 = vadd.f32 %v65_v10, %v64_v12  ;;  %v93_v52 = vsel %vm59_vm0, %v1647_v47, 0.0  ;;  %v95_v55 = vsel %vm59_vm0, %v1654_v50, 0.0  ;;  %v1668_v56 = vld [vmem:[%s2325_s0 + $0xa0] sm:$0xff]  ;;  %v97_v58 = vsel %vm59_vm0, %v1661_v53, 0.0  ;;  %v1675_v59 = vld [vmem:[%s2325_s0 + $0xa8] sm:$0xff]  ;;  %v1682_v62 = vld [vmem:[%s2325_s0 + $0xb0] sm:$0xff] }
   0x9   :  { %v99_v61 = vsel %vm59_vm0, %v1668_v56, 0.0  ;;  %v101_v0 = vsel %vm59_vm0, %v1675_v59, 0.0  ;;  %v1689_v5 = vld [vmem:[%s2325_s0 + $0xb8] sm:$0xff]  ;;  %v103_v7 = vsel %vm59_vm0, %v1682_v62, 0.0  ;;  %v1696_v9 = vld [vmem:[%s2325_s0 + $0xc0] sm:$0xff] }
   0xa   :  { %v68_v18 = vadd.f32 %v67_v13, %v66_v15  ;;  %v105_v12 = vsel %vm59_vm0, %v1689_v5, 0.0  ;;  %v1703_v13 = vld [vmem:[%s2325_s0 + $0xc8] sm:$0xff] }
   0xc   :  { %v70_v21 = vadd.f32 %v69_v16, %v68_v18  ;;  %v107_v16 = vsel %vm59_vm0, %v1696_v9, 0.0  ;;  %v1710_v18 = vld [vmem:[%s2325_s0 + $0xd0] sm:$0xff] }
   0xe   :  { %v72_v24 = vadd.f32 %v71_v19, %v70_v21  ;;  %v109_v21 = vsel %vm59_vm0, %v1703_v13, 0.0 }
  0x10   :  { %v74_v27 = vadd.f32 %v73_v22, %v72_v24  ;;  %v1717_v22 = vld [vmem:[%s2325_s0 + $0xd8] sm:$0xff] }
  0x12   :  { %v76_v30 = vadd.f32 %v75_v25, %v74_v27  ;;  %v111_v25 = vsel %vm59_vm0, %v1710_v18, 0.0  ;;  %v1724_v27 = vld [vmem:[%s2325_s0 + $0xe0] sm:$0xff] }
  0x14   :  { %v78_v33 = vadd.f32 %v77_v28, %v76_v30  ;;  %v113_v30 = vsel %vm59_vm0, %v1717_v22, 0.0 }
  0x16   :  { %v80_v36 = vadd.f32 %v79_v31, %v78_v33  ;;  %v1731_v31 = vld [vmem:[%s2325_s0 + $0xe8] sm:$0xff] }
  0x18   :  { %v82_v39 = vadd.f32 %v81_v34, %v80_v36  ;;  %v115_v34 = vsel %vm59_vm0, %v1724_v27, 0.0  ;;  %v1738_v36 = vld [vmem:[%s2325_s0 + $0xf0] sm:$0xff] }
  0x1a   :  { %v84_v42 = vadd.f32 %v83_v37, %v82_v39  ;;  %v117_v39 = vsel %vm59_vm0, %v1731_v31, 0.0 }
  0x1c   :  { %v86_v45 = vadd.f32 %v85_v40, %v84_v42  ;;  %v1745_v40 = vld [vmem:[%s2325_s0 + $0xf8] sm:$0xff] }
  0x1e   :  { %v88_v48 = vadd.f32 %v87_v43, %v86_v45  ;;  %v119_v43 = vsel %vm59_vm0, %v1738_v36, 0.0 }
  0x20   :  { %v90_v51 = vadd.f32 %v89_v46, %v88_v48  ;;  %v121_v46 = vsel %vm59_vm0, %v1745_v40, 0.0 }
  0x22   :  { %v92_v54 = vadd.f32 %v91_v49, %v90_v51 }
  0x24   :  { %v94_v57 = vadd.f32 %v93_v52, %v92_v54 }
  0x26   :  { %v96_v60 = vadd.f32 %v95_v55, %v94_v57 }
  0x28   :  { %v98_v63 = vadd.f32 %v97_v58, %v96_v60 }
  0x2a   :  { %v100_v6 = vadd.f32 %v99_v61, %v98_v63 }
  0x2c   :  { %v102_v10 = vadd.f32 %v101_v0, %v100_v6 }
  0x2e   :  { %v104_v15 = vadd.f32 %v103_v7, %v102_v10 }
  0x30   :  { %v106_v19 = vadd.f32 %v105_v12, %v104_v15 }
  0x32   :  { %v108_v24 = vadd.f32 %v107_v16, %v106_v19 }
  0x34   :  { %v110_v28 = vadd.f32 %v109_v21, %v108_v24 }
  0x36   :  { %v112_v33 = vadd.f32 %v111_v25, %v110_v28 }
  0x38   :  { %v114_v37 = vadd.f32 %v113_v30, %v112_v33 }
  0x3a   :  { %v116_v42 = vadd.f32 %v115_v34, %v114_v37 }
  0x3c   :  { %v118_v45 = vadd.f32 %v117_v39, %v116_v42 }
  0x3e   :  { %v120_v48 = vadd.f32 %v119_v43, %v118_v45 }
  0x40   :  { %v122_v49 = vadd.f32 %v121_v46, %v120_v48 }
  0x42   :  { %v123_v51 = vrot.slane %v122_v49, 4 }
  0x44   :  { %v124_v52 = vadd.f32 %v123_v51, %v122_v49 }
  0x46   :  { %v125_v54 = vrot.slane %v124_v52, 2 }
  0x48   :  { %v126_v55 = vadd.f32 %v125_v54, %v124_v52 }
  0x4a   :  { %v127_v57 = vrot.slane %v126_v55, 1 }
  0x4c   :  { %v128_v58 = vadd.f32 %v127_v57, %v126_v55 }
  0x4e   :  { %v1751_v60 = vmul.f32 0.00390625, %v128_v58 }
  0x50   :  { %v1755_v61 = vsub.f32 %v1530_v1, %v1751_v60  ;;  %v1759_v63 = vsub.f32 %v1535_v2, %v1751_v60  ;;  %v1763_v0 = vsub.f32 %v1540_v3, %v1751_v60  ;;  %v1767_v6 = vsub.f32 %v1545_v4, %v1751_v60  ;;  %v1782_v3 = vld [vmem:[%s2326_s3] sm:$0xff]  }
  0x51   :  { %v1771_v7 = vsub.f32 %v1556_v8, %v1751_v60  ;;  %v1786_v4 = vsub.f32 %v1563_v11, %v1751_v60  ;;  %v1792_v12 = vsub.f32 %v1570_v14, %v1751_v60  ;;  %1367 = vmatprep.subr.bf16.mxu1 %v1782_v3  ;;  %v1802_v24 = vsub.f32 %v1577_v17, %v1751_v60 }
  0x52   :  { %v260_v1 = vmul.f32 %v1755_v61, %v1755_v61  ;;  %v261_v10 = vmul.f32 %v1759_v63, %v1759_v63  ;;  %v262_v2 = vmul.f32 %v1763_v0, %v1763_v0  ;;  %v263_v8 = vmul.f32 %v1767_v6, %v1767_v6 }
  0x53   :  { %v264_v15 = vmul.f32 %v1771_v7, %v1771_v7  ;;  %v265_v14 = vmul.f32 %v1786_v4, %v1786_v4  ;;  %v1809_v30 = vsub.f32 %v1584_v20, %v1751_v60  ;;  %v266_v33 = vmul.f32 %v1792_v12, %v1792_v12 }
  0x54   :  { %v292_v16 = vsel %vm59_vm0, %v260_v1, 0.0  ;;  %v293_v19 = vsel %vm59_vm0, %v261_v10, 0.0  ;;  %v295_v21 = vsel %vm59_vm0, %v262_v2, 0.0  ;;  %v297_v25 = vsel %vm59_vm0, %v263_v8, 0.0 }
  0x55   :  { %v294_v11 = vadd.f32 %v293_v19, %v292_v16  ;;  %v299_v34 = vsel %vm59_vm0, %v264_v15, 0.0  ;;  %v1816_v17 = vsub.f32 %v1591_v23, %v1751_v60  ;;  %v267_v39 = vmul.f32 %v1802_v24, %v1802_v24 }
  0x56   :  { %v301_v42 = vsel %vm59_vm0, %v265_v14, 0.0  ;;  %v1823_v20 = vsub.f32 %v1598_v26, %v1751_v60  ;;  %v268_v45 = vmul.f32 %v1809_v30, %v1809_v30  ;;  %v303_v46 = vsel %vm59_vm0, %v266_v33, 0.0 }
  0x57   :  { %v296_v28 = vadd.f32 %v295_v21, %v294_v11  ;;  %v1830_v23 = vsub.f32 %v1605_v29, %v1751_v60  ;;  %v269_v49 = vmul.f32 %v1816_v17, %v1816_v17  ;;  %v305_v51 = vsel %vm59_vm0, %v267_v39, 0.0 }
  0x58   :  { %v1837_v26 = vsub.f32 %v1612_v32, %v1751_v60  ;;  %v270_v54 = vmul.f32 %v1823_v20, %v1823_v20  ;;  %v307_v55 = vsel %vm59_vm0, %v268_v45, 0.0  ;;  %v1844_v29 = vsub.f32 %v1619_v35, %v1751_v60 }
  0x59   :  { %v298_v37 = vadd.f32 %v297_v25, %v296_v28  ;;  %v271_v58 = vmul.f32 %v1830_v23, %v1830_v23  ;;  %v309_v1 = vsel %vm59_vm0, %v269_v49, 0.0  ;;  %v1851_v32 = vsub.f32 %v1626_v38, %v1751_v60 }
  0x5a   :  { %v272_v2 = vmul.f32 %v1837_v26, %v1837_v26  ;;  %v311_v8 = vsel %vm59_vm0, %v270_v54, 0.0  ;;  %v1858_v35 = vsub.f32 %v1633_v41, %v1751_v60  ;;  %v273_v16 = vmul.f32 %v1844_v29, %v1844_v29 }
  0x5b   :  { %v300_v43 = vadd.f32 %v299_v34, %v298_v37  ;;  %v313_v19 = vsel %vm59_vm0, %v271_v58, 0.0  ;;  %v1865_v38 = vsub.f32 %v1640_v44, %v1751_v60  ;;  %v274_v11 = vmul.f32 %v1851_v32, %v1851_v32 }
  0x5c   :  { %v315_v14 = vsel %vm59_vm0, %v272_v2, 0.0  ;;  %v1872_v41 = vsub.f32 %v1647_v47, %v1751_v60  ;;  %v275_v28 = vmul.f32 %v1858_v35, %v1858_v35  ;;  %v317_v33 = vsel %vm59_vm0, %v273_v16, 0.0 }
  0x5d   :  { %v302_v48 = vadd.f32 %v301_v42, %v300_v43  ;;  %v1879_v44 = vsub.f32 %v1654_v50, %v1751_v60  ;;  %v276_v37 = vmul.f32 %v1865_v38, %v1865_v38  ;;  %v319_v39 = vsel %vm59_vm0, %v274_v11, 0.0 }
  0x5e   :  { %v1886_v47 = vsub.f32 %v1661_v53, %v1751_v60  ;;  %v277_v43 = vmul.f32 %v1872_v41, %v1872_v41  ;;  %v321_v45 = vsel %vm59_vm0, %v275_v28, 0.0  ;;  %v1893_v50 = vsub.f32 %v1668_v56, %v1751_v60 }
  0x5f   :  { %v304_v52 = vadd.f32 %v303_v46, %v302_v48  ;;  %v278_v48 = vmul.f32 %v1879_v44, %v1879_v44  ;;  %v323_v49 = vsel %vm59_vm0, %v276_v37, 0.0  ;;  %v1900_v53 = vsub.f32 %v1675_v59, %v1751_v60 }
  0x60   :  { %v325_v54 = vsel %vm59_vm0, %v277_v43, 0.0  ;;  %v1907_v56 = vsub.f32 %v1682_v62, %v1751_v60  ;;  %v1914_v59 = vsub.f32 %v1689_v5, %v1751_v60  ;;  %v1921_v62 = vsub.f32 %v1696_v9, %v1751_v60 }
  0x61   :  { %v306_v57 = vadd.f32 %v305_v51, %v304_v52  ;;  %v279_v52 = vmul.f32 %v1886_v47, %v1886_v47  ;;  %v327_v58 = vsel %vm59_vm0, %v278_v48, 0.0  ;;  %v1928_v5 = vsub.f32 %v1703_v13, %v1751_v60 }
  0x62   :  { %v1935_v9 = vsub.f32 %v1710_v18, %v1751_v60  ;;  %v1942_v13 = vsub.f32 %v1717_v22, %v1751_v60  ;;  %v1949_v18 = vsub.f32 %v1724_v27, %v1751_v60  ;;  %v1956_v22 = vsub.f32 %v1731_v31, %v1751_v60 }
  0x63   :  { %v308_v10 = vadd.f32 %v307_v55, %v306_v57  ;;  %v280_v57 = vmul.f32 %v1893_v50, %v1893_v50  ;;  %v329_v2 = vsel %vm59_vm0, %v279_v52, 0.0  ;;  %v1963_v27 = vsub.f32 %v1738_v36, %v1751_v60 }
  0x64   :  { %v1970_v31 = vsub.f32 %v1745_v40, %v1751_v60 }
  0x65   :  { %v310_v15 = vadd.f32 %v309_v1, %v308_v10  ;;  %v281_v10 = vmul.f32 %v1900_v53, %v1900_v53  ;;  %v331_v16 = vsel %vm59_vm0, %v280_v57, 0.0  ;;  %v290_v36 = vmul.f32 %v1963_v27, %v1963_v27 }
  0x67   :  { %v312_v21 = vadd.f32 %v311_v8, %v310_v15  ;;  %v282_v15 = vmul.f32 %v1907_v56, %v1907_v56  ;;  %v333_v11 = vsel %vm59_vm0, %v281_v10, 0.0  ;;  %v351_v40 = vsel %vm59_vm0, %v290_v36, 0.0 }
  0x69   :  { %v314_v25 = vadd.f32 %v313_v19, %v312_v21  ;;  %v283_v21 = vmul.f32 %v1914_v59, %v1914_v59  ;;  %v335_v28 = vsel %vm59_vm0, %v282_v15, 0.0 }
  0x6b   :  { %v316_v34 = vadd.f32 %v315_v14, %v314_v25  ;;  %v284_v25 = vmul.f32 %v1921_v62, %v1921_v62  ;;  %v337_v37 = vsel %vm59_vm0, %v283_v21, 0.0 }
  0x6d   :  { %v318_v42 = vadd.f32 %v317_v33, %v316_v34  ;;  %v285_v34 = vmul.f32 %v1928_v5, %v1928_v5  ;;  %v339_v43 = vsel %vm59_vm0, %v284_v25, 0.0 }
  0x6f   :  { %v320_v46 = vadd.f32 %v319_v39, %v318_v42  ;;  %v286_v42 = vmul.f32 %v1935_v9, %v1935_v9  ;;  %v341_v48 = vsel %vm59_vm0, %v285_v34, 0.0 }
  0x71   :  { %v322_v51 = vadd.f32 %v321_v45, %v320_v46  ;;  %v287_v46 = vmul.f32 %v1942_v13, %v1942_v13  ;;  %v343_v52 = vsel %vm59_vm0, %v286_v42, 0.0 }
  0x73   :  { %v324_v55 = vadd.f32 %v323_v49, %v322_v51  ;;  %v288_v51 = vmul.f32 %v1949_v18, %v1949_v18  ;;  %v345_v57 = vsel %vm59_vm0, %v287_v46, 0.0 }
  0x75   :  { %v326_v1 = vadd.f32 %v325_v54, %v324_v55  ;;  %v289_v55 = vmul.f32 %v1956_v22, %v1956_v22 }
  0x77   :  { %v328_v8 = vadd.f32 %v327_v58, %v326_v1  ;;  %v347_v1 = vsel %vm59_vm0, %v288_v51, 0.0 }
  0x79   :  { %v330_v19 = vadd.f32 %v329_v2, %v328_v8  ;;  %v291_v2 = vmul.f32 %v1970_v31, %v1970_v31  ;;  %v349_v8 = vsel %vm59_vm0, %v289_v55, 0.0 }
  0x7b   :  { %v332_v14 = vadd.f32 %v331_v16, %v330_v19  ;;  %v353_v16 = vsel %vm59_vm0, %v291_v2, 0.0 }
  0x7d   :  { %v334_v33 = vadd.f32 %v333_v11, %v332_v14 }
  0x7f   :  { %v336_v39 = vadd.f32 %v335_v28, %v334_v33 }
  0x81   :  { %v338_v45 = vadd.f32 %v337_v37, %v336_v39 }
  0x83   :  { %v340_v49 = vadd.f32 %v339_v43, %v338_v45 }
  0x85   :  { %v342_v54 = vadd.f32 %v341_v48, %v340_v49 }
  0x87   :  { %v344_v58 = vadd.f32 %v343_v52, %v342_v54 }
  0x89   :  { %v346_v10 = vadd.f32 %v345_v57, %v344_v58 }
  0x8b   :  { %v348_v15 = vadd.f32 %v347_v1, %v346_v10  ;;  %v1468_v10 = vld [vmem:[%s2326_s3 + $0x10] sm:$0xff]  }
  0x8d   :  { %v350_v60 = vadd.f32 %v349_v8, %v348_v15  ;;  %v1469_v8 = vld [vmem:[%s2326_s3 + $0x18] sm:$0xff]  }
  0x8f   :  { %v352_v19 = vadd.f32 %v351_v40, %v350_v60  ;;  %v1470_v60 = vld [vmem:[%s2326_s3 + $0x20] sm:$0xff]  }
  0x91   :  { %v354_v21 = vadd.f32 %v353_v16, %v352_v19 }
  0x93   :  { %v355_v11 = vrot.slane %v354_v21, 4 }
  0x95   :  { %v356_v14 = vadd.f32 %v355_v11, %v354_v21  ;;  %v1472_v11 = vld [vmem:[%s2326_s3 + $0x30] sm:$0xff]  }
  0x97   :  { %v357_v25 = vrot.slane %v356_v14, 2 }
  0x99   :  { %v358_v28 = vadd.f32 %v357_v25, %v356_v14  ;;  %v1475_v14 = vld [vmem:[%s2327_s5 + $0x8] sm:$0xff]   ;;  %v1476_v25 = vld [vmem:[%s2327_s5 + $0x10] sm:$0xff]  }
  0x9b   :  { %v359_v33 = vrot.slane %v358_v28, 1 }
  0x9d   :  { %v360_v34 = vadd.f32 %v359_v33, %v358_v28  ;;  %v1477_v28 = vld [vmem:[%s2327_s5 + $0x18] sm:$0xff]   ;;  %v1478_v33 = vld [vmem:[%s2327_s5 + $0x20] sm:$0xff]  }
  0x9f   :  { %v361_v37 = vmul.f32 0.00390625, %v360_v34  ;;  %v1479_v34 = vld [vmem:[%s2327_s5 + $0x28] sm:$0xff]  }
  0xa1   :  { %v362_v39 = vadd.f32 1e-05, %v361_v37  ;;  %v2108_v37 = vld [vmem:[%s2328_s2] ss:$0 sm:$0xff] }
  0xa3   :  { %1482 = vrsqrt.f32 %v362_v39 }
  0xad   :  { %v1983_v42 = vpop.eup %1482 }
  0xae   :  { %v364_v43 = vmul.f32 %v1983_v42, %v1755_v61  ;;  %v365_v45 = vmul.f32 %v1983_v42, %v1759_v63  ;;  %v366_v46 = vmul.f32 %v1983_v42, %v1763_v0  ;;  %v367_v48 = vmul.f32 %v1983_v42, %v1767_v6 }
  0xaf   :  { %v368_v49 = vmul.f32 %v1983_v42, %v1771_v7  ;;  %v369_v51 = vmul.f32 %v1983_v42, %v1786_v4  ;;  %v370_v61 = vmul.f32 %v1983_v42, %v1792_v12  ;;  %v371_v63 = vmul.f32 %v1983_v42, %v1802_v24 }
  0xb0   :  { %v396_v52 = vpack.c.bf16 %v365_v45, %v364_v43  ;;  %v397_v54 = vpack.c.bf16 %v367_v48, %v366_v46  ;;  %v372_v0 = vmul.f32 %v1983_v42, %v1809_v30  ;;  %v380_v6 = vmul.f32 %v1983_v42, %v1865_v38 }
  0xb1   :  { %v398_v55 = vpack.c.bf16 %v369_v51, %v368_v49  ;;  %v381_v7 = vmul.f32 %v1983_v42, %v1872_v41  ;;  %v373_v4 = vmul.f32 %v1983_v42, %v1816_v17  ;;  %v382_v12 = vmul.f32 %v1983_v42, %v1879_v44  ;;  %v1467_v41 = vld [vmem:[%s2326_s3 + $0x8] sm:$0xff]  }
  0xb2   :  { %1335 = vmatprep.mubr.msk.bf16.mxu0 %vm59_vm0, %v396_v52  ;;  %v383_v24 = vmul.f32 %v1983_v42, %v1886_v47  ;;  %v384_v30 = vmul.f32 %v1983_v42, %v1893_v50  ;;  %v385_v38 = vmul.f32 %v1983_v42, %v1900_v53  ;;  %v399_v36 = vpack.c.bf16 %v371_v63, %v370_v61 }
  0xb3   :  { %1336 = vmatmul.mubr.msk.bf16.vlgmr.msra.gmra.mrb[0].mxu0 %vm59_vm0, %v397_v54  ;;  %v404_v57 = vpack.c.bf16 %v381_v7, %v380_v6  ;;  %v400_v44 = vpack.c.bf16 %v373_v4, %v372_v0  ;;  %v386_v47 = vmul.f32 %v1983_v42, %v1907_v56  ;;  %v387_v50 = vmul.f32 %v1983_v42, %v1914_v59 }
  0xb4   :  { %1339 = vmatprep.mubr.msk.bf16.mxu0 %vm59_vm0, %v398_v55  ;;  %v405_v58 = vpack.c.bf16 %v383_v24, %v382_v12  ;;  %v406_v17 = vpack.c.bf16 %v385_v38, %v384_v30  ;;  %v388_v53 = vmul.f32 %v1983_v42, %v1921_v62  ;;  %v389_v1 = vmul.f32 %v1983_v42, %v1928_v5 }
  0xb5   :  { %1351 = vmatprep.mubr.msk.bf16.mxu1 %vm59_vm0, %v404_v57  ;;  %v374_v56 = vmul.f32 %v1983_v42, %v1823_v20  ;;  %v375_v59 = vmul.f32 %v1983_v42, %v1830_v23  ;;  %v376_v62 = vmul.f32 %v1983_v42, %v1837_v26  ;;  %v407_v5 = vpack.c.bf16 %v387_v50, %v386_v47 }
  0xb6   :  { %1352 = vmatmul.mubr.msk.bf16.vlgmr.msra.gmra.mrb[0].mxu1 %vm59_vm0, %v405_v58  ;;  %v408_v2 = vpack.c.bf16 %v389_v1, %v388_v53  ;;  %v390_v23 = vmul.f32 %v1983_v42, %v1935_v9  ;;  %v391_v26 = vmul.f32 %v1983_v42, %v1942_v13  ;;  %v393_v40 = vmul.f32 %v1983_v42, %v1956_v22  ;;  %v1471_v22 = vld [vmem:[%s2326_s3 + $0x28] sm:$0xff]  }
  0xb7   :  { %1355 = vmatprep.mubr.msk.bf16.mxu1 %vm59_vm0, %v406_v17  ;;  %1368 = vmatpush3.bf16.msra.mxu1 %v1782_v3  ;;  %v377_v3 = vmul.f32 %v1983_v42, %v1844_v29  ;;  %v401_v20 = vpack.c.bf16 %v375_v59, %v374_v56  ;;  %v392_v29 = vmul.f32 %v1983_v42, %v1949_v18 }
  0xb8   :  { %1369 = vmatprep.subr.bf16.mxu1 %v1467_v41  ;;  %v378_v9 = vmul.f32 %v1983_v42, %v1851_v32  ;;  %v379_v13 = vmul.f32 %v1983_v42, %v1858_v35  ;;  %v409_v18 = vpack.c.bf16 %v391_v26, %v390_v23  ;;  %v394_v21 = vmul.f32 %v1983_v42, %v1963_v27  ;;  %v1473_v27 = vld [vmem:[%s2326_s3 + $0x38] sm:$0xff]  }
  0xb9   :  { %v402_v15 = vpack.c.bf16 %v377_v3, %v376_v62  ;;  %v410_v16 = vpack.c.bf16 %v393_v40, %v392_v29  ;;  %v395_v32 = vmul.f32 %v1983_v42, %v1970_v31  ;;  %v1474_v31 = vld [vmem:[%s2327_s5] sm:$0xff]  }
  0xba   :  { %v403_v19 = vpack.c.bf16 %v379_v13, %v378_v9  ;;  %1415 = vmatprep.subr.bf16.mxu0 %v1474_v31 }
  0xbb   :  { %1340 = vmatmul.mubr.msk.bf16.gmra.mrb[4].mxu0 %vm59_vm0, %v399_v36  ;;  %1370 = vmatpush3.bf16.msra.mxu1 %v1467_v41  ;;  %v411_v35 = vpack.c.bf16 %v395_v32, %v394_v21 }
  0xbc   :  { %1343 = vmatprep.mubr.msk.bf16.mxu0 %vm59_vm0, %v400_v44  ;;  %1371 = vmatprep.subr.bf16.mxu1 %v1468_v10 }
  0xbd   :  { %1416 = vmatpush3.bf16.msra.mxu0 %v1474_v31 }
  0xbe   :  { %1356 = vmatmul.mubr.msk.bf16.gmra.mrb[4].mxu1 %vm59_vm0, %v407_v5  ;;  %1417 = vmatprep.subr.bf16.mxu0 %v1475_v14 }
  0xbf   :  { %1359 = vmatprep.mubr.msk.bf16.mxu1 %vm59_vm0, %v408_v2  ;;  %1372 = vmatpush3.bf16.msra.mxu1 %v1468_v10 }
  0xc0   :  { %1373 = vmatprep.subr.bf16.mxu1 %v1469_v8 }
  0xc1   :  { %1418 = vmatpush3.bf16.msra.mxu0 %v1475_v14 }
  0xc2   :  { %1419 = vmatprep.subr.bf16.mxu0 %v1476_v25 }
  0xc3   :  { %1344 = vmatmul.mubr.msk.bf16.gmra.mrb[8].mxu0 %vm59_vm0, %v401_v20  ;;  %1374 = vmatpush3.bf16.msra.mxu1 %v1469_v8 }
  0xc4   :  { %1347 = vmatprep.mubr.msk.bf16.mxu0 %vm59_vm0, %v402_v15  ;;  %1375 = vmatprep.subr.bf16.mxu1 %v1470_v60 }
  0xc5   :  { %1420 = vmatpush3.bf16.msra.mxu0 %v1476_v25 }
  0xc6   :  { %1360 = vmatmul.mubr.msk.bf16.gmra.mrb[8].mxu1 %vm59_vm0, %v409_v18  ;;  %1421 = vmatprep.subr.bf16.mxu0 %v1477_v28 }
  0xc7   :  { %1363 = vmatprep.mubr.msk.bf16.mxu1 %vm59_vm0, %v410_v16  ;;  %1376 = vmatpush3.bf16.msra.mxu1 %v1470_v60 }
  0xc8   :  { %1377 = vmatprep.subr.bf16.mxu1 %v1471_v22 }
  0xc9   :  { %1422 = vmatpush3.bf16.msra.mxu0 %v1477_v28 }
  0xca   :  { %1423 = vmatprep.subr.bf16.mxu0 %v1478_v33 }
  0xcb   :  { %1348 = vmatmul.mubr.msk.bf16.gmra.mrb[12].mxu0 %vm59_vm0, %v403_v19  ;;  %1378 = vmatpush3.bf16.msra.mxu1 %v1471_v22 }
  0xcc   :  { %1379 = vmatprep.subr.bf16.mxu1 %v1472_v11 }
  0xcd   :  { %1424 = vmatpush3.bf16.msra.mxu0 %v1478_v33 }
  0xce   :  { %1364 = vmatmul.mubr.msk.bf16.gmra.mrb[12].mxu1 %vm59_vm0, %v411_v35  ;;  %1425 = vmatprep.subr.bf16.mxu0 %v1479_v34 }
  0xcf   :  { %1380 = vmatpush3.bf16.msra.mxu1 %v1472_v11 }
  0xd0   :  { %1381 = vmatprep.subr.bf16.mxu1 %v1473_v27 }
  0xd1   :  { %1426 = vmatpush3.bf16.msra.mxu0 %v1479_v34 }
  0xd3   :  { %1382 = vmatpush3.bf16.msra.mxu1 %v1473_v27 }
 0x186   :  { %v1337_v39 = vpop.f32.mrb[0].mxu0 }
 0x187   :  { %v518_v42 = vadd.f32 %v1337_v39, %v2108_v37  ;;  %v509_v43 = vpop.f32.mrb[1].mxu0 }
 0x188   :  { %v510_v45 = vadd.f32 %v2108_v37, %v509_v43  ;;  %v1338_v46 = vpop.f32.mrb[2].mxu0 }
 0x189   :  { %v521_v48 = vadd.f32 %v1338_v46, %v2108_v37  ;;  %v512_v49 = vpop.f32.mrb[3].mxu0  ;;  %v638_v52 = vmax.f32 %v518_v42, 0.0  ;;  %v1353_v55 = vpop.f32.mrb[0].mxu1 }
 0x18a   :  { %v513_v51 = vadd.f32 %v2108_v37, %v512_v49  ;;  %v636_v61 = vmax.f32 %v510_v45, 0.0  ;;  %v582_v0 = vadd.f32 %v1353_v55, %v2108_v37  ;;  %v573_v6 = vpop.f32.mrb[1].mxu1 }
 0x18b   :  { %v639_v54 = vmax.f32 %v521_v48, 0.0  ;;  %v574_v4 = vadd.f32 %v2108_v37, %v573_v6  ;;  %v1354_v12 = vpop.f32.mrb[2].mxu1 }
 0x18c   :  { %v637_v63 = vmax.f32 %v513_v51, 0.0  ;;  %v654_v57 = vmax.f32 %v582_v0, 0.0  ;;  %v585_v38 = vadd.f32 %v1354_v12, %v2108_v37  ;;  %v576_v58 = vpop.f32.mrb[3].mxu1 }
 0x18d   :  { %v669_v7 = vpack.c.bf16 %v639_v54, %v638_v52  ;;  %v652_v17 = vmax.f32 %v574_v4, 0.0  ;;  %v577_v44 = vadd.f32 %v2108_v37, %v576_v58 }
 0x18e   :  { %v668_v24 = vpack.c.bf16 %v637_v63, %v636_v61  ;;  %v1341_v30 = vpop.f32.mrb[4].mxu0  ;;  %v655_v53 = vmax.f32 %v585_v38, 0.0 }
 0x18f   :  { %v534_v41 = vadd.f32 %v1341_v30, %v2108_v37  ;;  %v525_v36 = vpop.f32.mrb[5].mxu0  ;;  %v653_v56 = vmax.f32 %v577_v44, 0.0 }
 0x190   :  { %v526_v47 = vadd.f32 %v2108_v37, %v525_v36  ;;  %v1342_v50 = vpop.f32.mrb[6].mxu0  ;;  %1383 = vmatprep.mubr.bf16.mxu1 %v668_v24  ;;  %v2122_v62 = vpack.c.bf16 %v655_v53, %v654_v57 }
 0x191   :  { %v537_v1 = vadd.f32 %v1342_v50, %v2108_v37  ;;  %v528_v10 = vpop.f32.mrb[7].mxu0  ;;  %1384 = vmatmul.mubr.bf16.vlgmr.msra.gmra.mrb[16].mxu1 %v669_v7  ;;  %v642_v3 = vmax.f32 %v534_v41, 0.0  ;;  %v2124_v2 = vpack.c.bf16 %v653_v56, %v652_v17  ;;  %v1357_v8 = vpop.f32.mrb[4].mxu1 }
 0x192   :  { %v529_v59 = vadd.f32 %v2108_v37, %v528_v10  ;;  %v640_v20 = vmax.f32 %v526_v47, 0.0  ;;  %v598_v23 = vadd.f32 %v1357_v8, %v2108_v37  ;;  %v589_v26 = vpop.f32.mrb[5].mxu1 }
 0x193   :  { %v643_v5 = vmax.f32 %v537_v1, 0.0  ;;  %v590_v40 = vadd.f32 %v2108_v37, %v589_v26  ;;  %v1358_v60 = vpop.f32.mrb[6].mxu1 }
 0x194   :  { %v641_v15 = vmax.f32 %v529_v59, 0.0  ;;  %v658_v18 = vmax.f32 %v598_v23, 0.0  ;;  %v601_v16 = vadd.f32 %v1358_v60, %v2108_v37  ;;  %v592_v22 = vpop.f32.mrb[7].mxu1 }
 0x195   :  { %v671_v29 = vpack.c.bf16 %v643_v5, %v642_v3  ;;  %v656_v32 = vmax.f32 %v590_v40, 0.0  ;;  %v593_v35 = vadd.f32 %v2108_v37, %v592_v22 }
 0x196   :  { %v670_v9 = vpack.c.bf16 %v641_v15, %v640_v20  ;;  %v1345_v13 = vpop.f32.mrb[8].mxu0  ;;  %v659_v31 = vmax.f32 %v601_v16, 0.0 }
 0x197   :  { %v550_v19 = vadd.f32 %v1345_v13, %v2108_v37  ;;  %v541_v21 = vpop.f32.mrb[9].mxu0  ;;  %v657_v28 = vmax.f32 %v593_v35, 0.0 }
 0x198   :  { %v542_v11 = vadd.f32 %v2108_v37, %v541_v21  ;;  %v1346_v27 = vpop.f32.mrb[10].mxu0  ;;  %1387 = vmatprep.mubr.bf16.mxu1 %v670_v9  ;;  %v679_v34 = vpack.c.bf16 %v659_v31, %v658_v18 }
 0x199   :  { %v553_v14 = vadd.f32 %v1346_v27, %v2108_v37  ;;  %v544_v25 = vpop.f32.mrb[11].mxu0  ;;  %1388 = vmatmul.mubr.bf16.gmra.mrb[20].mxu1 %v671_v29  ;;  %v646_v39 = vmax.f32 %v550_v19, 0.0  ;;  %v678_v43 = vpack.c.bf16 %v657_v28, %v656_v32  ;;  %v1361_v45 = vpop.f32.mrb[8].mxu1 }
 0x19a   :  { %v545_v33 = vadd.f32 %v2108_v37, %v544_v25  ;;  %v644_v46 = vmax.f32 %v542_v11, 0.0  ;;  %v614_v49 = vadd.f32 %v1361_v45, %v2108_v37  ;;  %v605_v51 = vpop.f32.mrb[9].mxu1 }
 0x19b   :  { %v647_v42 = vmax.f32 %v553_v14, 0.0  ;;  %v606_v54 = vadd.f32 %v2108_v37, %v605_v51  ;;  %v1362_v55 = vpop.f32.mrb[10].mxu1 }
 0x19c   :  { %v645_v48 = vmax.f32 %v545_v33, 0.0  ;;  %v662_v0 = vmax.f32 %v614_v49, 0.0  ;;  %v617_v6 = vadd.f32 %v1362_v55, %v2108_v37  ;;  %v608_v7 = vpop.f32.mrb[11].mxu1 }
 0x19d   :  { %v673_v52 = vpack.c.bf16 %v647_v42, %v646_v39  ;;  %v660_v24 = vmax.f32 %v606_v54, 0.0  ;;  %v609_v30 = vadd.f32 %v2108_v37, %v608_v7 }
 0x19e   :  { %v672_v61 = vpack.c.bf16 %v645_v48, %v644_v46  ;;  %v1349_v63 = vpop.f32.mrb[12].mxu0  ;;  %v663_v58 = vmax.f32 %v617_v6, 0.0 }
 0x19f   :  { %v566_v4 = vadd.f32 %v1349_v63, %v2108_v37  ;;  %v557_v12 = vpop.f32.mrb[13].mxu0  ;;  %v661_v17 = vmax.f32 %v609_v30, 0.0 }
 0x1a0   :  { %v558_v57 = vadd.f32 %v2108_v37, %v557_v12  ;;  %v1350_v38 = vpop.f32.mrb[14].mxu0  ;;  %1391 = vmatprep.mubr.bf16.mxu1 %v672_v61  ;;  %v681_v47 = vpack.c.bf16 %v663_v58, %v662_v0 }
 0x1a1   :  { %v569_v41 = vadd.f32 %v1350_v38, %v2108_v37  ;;  %v560_v36 = vpop.f32.mrb[15].mxu0  ;;  %1392 = vmatmul.mubr.bf16.gmra.mrb[24].mxu1 %v673_v52  ;;  %v650_v50 = vmax.f32 %v566_v4, 0.0  ;;  %v680_v1 = vpack.c.bf16 %v661_v17, %v660_v24  ;;  %v1365_v10 = vpop.f32.mrb[12].mxu1 }
 0x1a2   :  { %v561_v44 = vadd.f32 %v2108_v37, %v560_v36  ;;  %v648_v56 = vmax.f32 %v558_v57, 0.0  ;;  %v630_v3 = vadd.f32 %v1365_v10, %v2108_v37  ;;  %v621_v5 = vpop.f32.mrb[13].mxu1 }
 0x1a3   :  { %v651_v53 = vmax.f32 %v569_v41, 0.0  ;;  %v622_v20 = vadd.f32 %v2108_v37, %v621_v5  ;;  %v1366_v15 = vpop.f32.mrb[14].mxu1 }
 0x1a4   :  { %v649_v59 = vmax.f32 %v561_v44, 0.0  ;;  %v666_v26 = vmax.f32 %v630_v3, 0.0  ;;  %v633_v29 = vadd.f32 %v1366_v15, %v2108_v37  ;;  %v624_v40 = vpop.f32.mrb[15].mxu1 }
 0x1a5   :  { %v675_v8 = vpack.c.bf16 %v651_v53, %v650_v50  ;;  %v664_v60 = vmax.f32 %v622_v20, 0.0  ;;  %v625_v9 = vadd.f32 %v2108_v37, %v624_v40  ;;  %v1480_v37 = vld [vmem:[%s2327_s5 + $0x30] sm:$0xff]  }
 0x1a6   :  { %v674_v23 = vpack.c.bf16 %v649_v59, %v648_v56  ;;  %v667_v13 = vmax.f32 %v633_v29, 0.0  ;;  %1427 = vmatprep.subr.bf16.mxu0 %v1480_v37 }
 0x1a7   :  { %v665_v18 = vmax.f32 %v625_v9, 0.0  ;;  %1428 = vmatpush3.bf16.msra.mxu0 %v1480_v37 }
 0x1a8   :  { %1395 = vmatprep.mubr.bf16.mxu1 %v674_v23  ;;  %v683_v16 = vpack.c.bf16 %v667_v13, %v666_v26 }
 0x1a9   :  { %1396 = vmatmul.mubr.bf16.gmra.mrb[28].mxu1 %v675_v8  ;;  %v682_v22 = vpack.c.bf16 %v665_v18, %v664_v60 }
 0x1aa   :  { %1399 = vmatprep.mubr.bf16.mxu1 %v2124_v2  ;;  %v1481_v2 = vld [vmem:[%s2327_s5 + $0x38] sm:$0xff]  }
 0x1ab   :  { %1429 = vmatprep.subr.bf16.mxu0 %v1481_v2 }
 0x1ac   :  { %1430 = vmatpush3.bf16.msra.mxu0 %v1481_v2 }
 0x1b1   :  { %1400 = vmatmul.mubr.bf16.gmra.mrb[32].mxu1 %v2122_v62  ;;  %v2157_v62 = vld [vmem:[%s2329_s4] ss:$0 sm:$0xff] }
 0x1b2   :  { %1403 = vmatprep.mubr.bf16.mxu1 %v678_v43 }
 0x1b9   :  { %1404 = vmatmul.mubr.bf16.gmra.mrb[36].mxu1 %v679_v34 }
 0x1ba   :  { %1407 = vmatprep.mubr.bf16.mxu1 %v680_v1 }
 0x1c1   :  { %1408 = vmatmul.mubr.bf16.gmra.mrb[40].mxu1 %v681_v47 }
 0x1c2   :  { %1411 = vmatprep.mubr.bf16.mxu1 %v682_v22 }
 0x1c9   :  { %1412 = vmatmul.mubr.bf16.gmra.mrb[44].mxu1 %v683_v16 }
 0x264   :  { %v1385_v19 = vpop.f32.mrb[16].mxu1 }
 0x265   :  { %v798_v21 = vadd.f32 %v1385_v19, %v2157_v62  ;;  %v789_v32 = vpop.f32.mrb[17].mxu1 }
 0x266   :  { %v790_v35 = vadd.f32 %v2157_v62, %v789_v32  ;;  %v1386_v11 = vpop.f32.mrb[18].mxu1 }
 0x267   :  { %v801_v27 = vadd.f32 %v1386_v11, %v2157_v62  ;;  %v792_v31 = vpop.f32.mrb[19].mxu1  ;;  %v918_v25 = vmax.f32 %v798_v21, 0.0 }
 0x268   :  { %v793_v14 = vadd.f32 %v2157_v62, %v792_v31  ;;  %v916_v33 = vmax.f32 %v790_v35, 0.0 }
 0x269   :  { %v919_v28 = vmax.f32 %v801_v27, 0.0 }
 0x26a   :  { %v917_v34 = vmax.f32 %v793_v14, 0.0 }
 0x26b   :  { %v949_v39 = vpack.c.bf16 %v919_v28, %v918_v25 }
 0x26c   :  { %v948_v42 = vpack.c.bf16 %v917_v34, %v916_v33  ;;  %v1389_v43 = vpop.f32.mrb[20].mxu1 }
 0x26d   :  { %v814_v45 = vadd.f32 %v1389_v43, %v2157_v62  ;;  %v805_v46 = vpop.f32.mrb[21].mxu1 }
 0x26e   :  { %v806_v48 = vadd.f32 %v2157_v62, %v805_v46  ;;  %v1390_v49 = vpop.f32.mrb[22].mxu1  ;;  %1431 = vmatprep.mubr.bf16.mxu0 %v948_v42 }
 0x26f   :  { %v817_v51 = vadd.f32 %v1390_v49, %v2157_v62  ;;  %v808_v52 = vpop.f32.mrb[23].mxu1  ;;  %1432 = vmatmul.mubr.bf16.vlgmr.msra.gmra.mrb[16].mxu0 %v949_v39  ;;  %v922_v55 = vmax.f32 %v814_v45, 0.0 }
 0x270   :  { %v809_v54 = vadd.f32 %v2157_v62, %v808_v52  ;;  %v920_v63 = vmax.f32 %v806_v48, 0.0 }
 0x271   :  { %v923_v61 = vmax.f32 %v817_v51, 0.0 }
 0x272   :  { %v921_v0 = vmax.f32 %v809_v54, 0.0 }
 0x273   :  { %v951_v6 = vpack.c.bf16 %v923_v61, %v922_v55 }
 0x274   :  { %v950_v7 = vpack.c.bf16 %v921_v0, %v920_v63  ;;  %v1393_v4 = vpop.f32.mrb[24].mxu1 }
 0x275   :  { %v830_v12 = vadd.f32 %v1393_v4, %v2157_v62  ;;  %v821_v24 = vpop.f32.mrb[25].mxu1 }
 0x276   :  { %v822_v30 = vadd.f32 %v2157_v62, %v821_v24  ;;  %v1394_v57 = vpop.f32.mrb[26].mxu1  ;;  %1435 = vmatprep.mubr.bf16.mxu0 %v950_v7 }
 0x277   :  { %v833_v38 = vadd.f32 %v1394_v57, %v2157_v62  ;;  %v824_v58 = vpop.f32.mrb[27].mxu1  ;;  %1436 = vmatmul.mubr.bf16.gmra.mrb[20].mxu0 %v951_v6  ;;  %v926_v36 = vmax.f32 %v830_v12, 0.0 }
 0x278   :  { %v825_v41 = vadd.f32 %v2157_v62, %v824_v58  ;;  %v924_v44 = vmax.f32 %v822_v30, 0.0 }
 0x279   :  { %v927_v17 = vmax.f32 %v833_v38, 0.0 }
 0x27a   :  { %v925_v47 = vmax.f32 %v825_v41, 0.0 }
 0x27b   :  { %v953_v50 = vpack.c.bf16 %v927_v17, %v926_v36 }
 0x27c   :  { %v952_v53 = vpack.c.bf16 %v925_v47, %v924_v44  ;;  %v1397_v1 = vpop.f32.mrb[28].mxu1 }
 0x27d   :  { %v846_v10 = vadd.f32 %v1397_v1, %v2157_v62  ;;  %v837_v56 = vpop.f32.mrb[29].mxu1 }
 0x27e   :  { %v838_v59 = vadd.f32 %v2157_v62, %v837_v56  ;;  %v1398_v3 = vpop.f32.mrb[30].mxu1  ;;  %1439 = vmatprep.mubr.bf16.mxu0 %v952_v53 }
 0x27f   :  { %v849_v5 = vadd.f32 %v1398_v3, %v2157_v62  ;;  %v840_v8 = vpop.f32.mrb[31].mxu1  ;;  %1440 = vmatmul.mubr.bf16.gmra.mrb[24].mxu0 %v953_v50  ;;  %v930_v15 = vmax.f32 %v846_v10, 0.0 }
 0x280   :  { %v841_v20 = vadd.f32 %v2157_v62, %v840_v8  ;;  %v928_v26 = vmax.f32 %v838_v59, 0.0 }
 0x281   :  { %v931_v23 = vmax.f32 %v849_v5, 0.0 }
 0x282   :  { %v929_v29 = vmax.f32 %v841_v20, 0.0  ;;  %v2194_v20 = vld [vmem:[%s2330_s6] ss:$0 sm:$0xff] }
 0x283   :  { %v955_v40 = vpack.c.bf16 %v931_v23, %v930_v15 }
 0x284   :  { %v954_v60 = vpack.c.bf16 %v929_v29, %v928_v26  ;;  %v1401_v9 = vpop.f32.mrb[32].mxu1 }
 0x285   :  { %v862_v13 = vadd.f32 %v1401_v9, %v2157_v62  ;;  %v853_v18 = vpop.f32.mrb[33].mxu1 }
 0x286   :  { %v854_v16 = vadd.f32 %v2157_v62, %v853_v18  ;;  %v1402_v22 = vpop.f32.mrb[34].mxu1  ;;  %1443 = vmatprep.mubr.bf16.mxu0 %v954_v60 }
 0x287   :  { %v865_v37 = vadd.f32 %v1402_v22, %v2157_v62  ;;  %v856_v2 = vpop.f32.mrb[35].mxu1  ;;  %1444 = vmatmul.mubr.bf16.gmra.mrb[28].mxu0 %v955_v40  ;;  %v934_v21 = vmax.f32 %v862_v13, 0.0 }
 0x288   :  { %v857_v19 = vadd.f32 %v2157_v62, %v856_v2  ;;  %v932_v35 = vmax.f32 %v854_v16, 0.0 }
 0x289   :  { %v935_v32 = vmax.f32 %v865_v37, 0.0 }
 0x28a   :  { %v933_v11 = vmax.f32 %v857_v19, 0.0 }
 0x28b   :  { %v957_v27 = vpack.c.bf16 %v935_v32, %v934_v21 }
 0x28c   :  { %v956_v31 = vpack.c.bf16 %v933_v11, %v932_v35  ;;  %v1405_v14 = vpop.f32.mrb[36].mxu1 }
 0x28d   :  { %v878_v25 = vadd.f32 %v1405_v14, %v2157_v62  ;;  %v869_v28 = vpop.f32.mrb[37].mxu1 }
 0x28e   :  { %v870_v33 = vadd.f32 %v2157_v62, %v869_v28  ;;  %v1406_v34 = vpop.f32.mrb[38].mxu1  ;;  %1447 = vmatprep.mubr.bf16.mxu0 %v956_v31 }
 0x28f   :  { %v881_v39 = vadd.f32 %v1406_v34, %v2157_v62  ;;  %v872_v42 = vpop.f32.mrb[39].mxu1  ;;  %1448 = vmatmul.mubr.bf16.gmra.mrb[32].mxu0 %v957_v27  ;;  %v938_v45 = vmax.f32 %v878_v25, 0.0 }
 0x290   :  { %v873_v43 = vadd.f32 %v2157_v62, %v872_v42  ;;  %v936_v48 = vmax.f32 %v870_v33, 0.0 }
 0x291   :  { %v939_v46 = vmax.f32 %v881_v39, 0.0 }
 0x292   :  { %v937_v49 = vmax.f32 %v873_v43, 0.0 }
 0x293   :  { %v959_v51 = vpack.c.bf16 %v939_v46, %v938_v45 }
 0x294   :  { %v958_v52 = vpack.c.bf16 %v937_v49, %v936_v48  ;;  %v1409_v54 = vpop.f32.mrb[40].mxu1 }
 0x295   :  { %v894_v55 = vadd.f32 %v1409_v54, %v2157_v62  ;;  %v885_v61 = vpop.f32.mrb[41].mxu1 }
 0x296   :  { %v886_v63 = vadd.f32 %v2157_v62, %v885_v61  ;;  %v1410_v0 = vpop.f32.mrb[42].mxu1  ;;  %1451 = vmatprep.mubr.bf16.mxu0 %v958_v52 }
 0x297   :  { %v897_v6 = vadd.f32 %v1410_v0, %v2157_v62  ;;  %v888_v7 = vpop.f32.mrb[43].mxu1  ;;  %1452 = vmatmul.mubr.bf16.gmra.mrb[36].mxu0 %v959_v51  ;;  %v942_v12 = vmax.f32 %v894_v55, 0.0 }
 0x298   :  { %v889_v4 = vadd.f32 %v2157_v62, %v888_v7  ;;  %v940_v30 = vmax.f32 %v886_v63, 0.0 }
 0x299   :  { %v943_v24 = vmax.f32 %v897_v6, 0.0 }
 0x29a   :  { %v941_v57 = vmax.f32 %v889_v4, 0.0 }
 0x29b   :  { %v961_v38 = vpack.c.bf16 %v943_v24, %v942_v12 }
 0x29c   :  { %v960_v58 = vpack.c.bf16 %v941_v57, %v940_v30  ;;  %v1413_v41 = vpop.f32.mrb[44].mxu1 }
 0x29d   :  { %v910_v36 = vadd.f32 %v1413_v41, %v2157_v62  ;;  %v901_v17 = vpop.f32.mrb[45].mxu1 }
 0x29e   :  { %v902_v44 = vadd.f32 %v2157_v62, %v901_v17  ;;  %v1414_v47 = vpop.f32.mrb[46].mxu1  ;;  %1455 = vmatprep.mubr.bf16.mxu0 %v960_v58 }
 0x29f   :  { %v913_v50 = vadd.f32 %v1414_v47, %v2157_v62  ;;  %v904_v53 = vpop.f32.mrb[47].mxu1  ;;  %1456 = vmatmul.mubr.bf16.gmra.mrb[40].mxu0 %v961_v38  ;;  %v946_v10 = vmax.f32 %v910_v36, 0.0 }
 0x2a0   :  { %v905_v1 = vadd.f32 %v2157_v62, %v904_v53  ;;  %v944_v59 = vmax.f32 %v902_v44, 0.0 }
 0x2a1   :  { %v947_v56 = vmax.f32 %v913_v50, 0.0 }
 0x2a2   :  { %v945_v3 = vmax.f32 %v905_v1, 0.0 }
 0x2a3   :  { %v963_v5 = vpack.c.bf16 %v947_v56, %v946_v10 }
 0x2a4   :  { %v962_v8 = vpack.c.bf16 %v945_v3, %v944_v59 }
 0x2a6   :  { %1459 = vmatprep.mubr.bf16.mxu0 %v962_v8 }
 0x2a7   :  { %1460 = vmatmul.mubr.bf16.gmra.mrb[44].mxu0 %v963_v5 }
 0x342   :  { %v1433_v15 = vpop.f32.mrb[16].mxu0 }
 0x343   :  { %v1078_v23 = vadd.f32 %v1433_v15, %v2194_v20  ;;  %v1069_v26 = vpop.f32.mrb[17].mxu0 }
 0x344   :  { %v1070_v29 = vadd.f32 %v2194_v20, %v1069_v26  ;;  %v1434_v62 = vpop.f32.mrb[18].mxu0 }
 0x345   :  { %1198 = vst [vmem:[%s2331_s7 + $0x10] sm:$0xff] %v1078_v23  ;;  %v1081_v40 = vadd.f32 %v1434_v62, %v2194_v20  ;;  %v1072_v60 = vpop.f32.mrb[19].mxu0 }
 0x346   :  { %1196 = vst [vmem:[%s2331_s7] sm:$0xff] %v1070_v29  ;;  %v1073_v9 = vadd.f32 %v2194_v20, %v1072_v60 }
 0x347   :  { %1199 = vst [vmem:[%s2331_s7 + $0x18] sm:$0xff] %v1081_v40 }
 0x348   :  { %1197 = vst [vmem:[%s2331_s7 + $0x8] sm:$0xff] %v1073_v9 }
 0x34a   :  { %v1437_v13 = vpop.f32.mrb[20].mxu0 }
 0x34b   :  { %v1094_v18 = vadd.f32 %v1437_v13, %v2194_v20  ;;  %v1085_v16 = vpop.f32.mrb[21].mxu0 }
 0x34c   :  { %v1086_v22 = vadd.f32 %v2194_v20, %v1085_v16  ;;  %v1438_v37 = vpop.f32.mrb[22].mxu0 }
 0x34d   :  { %1202 = vst [vmem:[%s2331_s7 + $0x30] sm:$0xff] %v1094_v18  ;;  %v1097_v2 = vadd.f32 %v1438_v37, %v2194_v20  ;;  %v1088_v19 = vpop.f32.mrb[23].mxu0 }
 0x34e   :  { %1200 = vst [vmem:[%s2331_s7 + $0x20] sm:$0xff] %v1086_v22  ;;  %v1089_v21 = vadd.f32 %v2194_v20, %v1088_v19 }
 0x34f   :  { %1203 = vst [vmem:[%s2331_s7 + $0x38] sm:$0xff] %v1097_v2 }
 0x350   :  { %1201 = vst [vmem:[%s2331_s7 + $0x28] sm:$0xff] %v1089_v21 }
 0x352   :  { %v1441_v32 = vpop.f32.mrb[24].mxu0 }
 0x353   :  { %v1110_v35 = vadd.f32 %v1441_v32, %v2194_v20  ;;  %v1101_v11 = vpop.f32.mrb[25].mxu0 }
 0x354   :  { %v1102_v27 = vadd.f32 %v2194_v20, %v1101_v11  ;;  %v1442_v31 = vpop.f32.mrb[26].mxu0 }
 0x355   :  { %1206 = vst [vmem:[%s2331_s7 + $0x50] sm:$0xff] %v1110_v35  ;;  %v1113_v14 = vadd.f32 %v1442_v31, %v2194_v20  ;;  %v1104_v25 = vpop.f32.mrb[27].mxu0 }
 0x356   :  { %1204 = vst [vmem:[%s2331_s7 + $0x40] sm:$0xff] %v1102_v27  ;;  %v1105_v28 = vadd.f32 %v2194_v20, %v1104_v25 }
 0x357   :  { %1207 = vst [vmem:[%s2331_s7 + $0x58] sm:$0xff] %v1113_v14 }
 0x358   :  { %1205 = vst [vmem:[%s2331_s7 + $0x48] sm:$0xff] %v1105_v28 }
 0x35a   :  { %v1445_v33 = vpop.f32.mrb[28].mxu0 }
 0x35b   :  { %v1126_v34 = vadd.f32 %v1445_v33, %v2194_v20  ;;  %v1117_v39 = vpop.f32.mrb[29].mxu0 }
 0x35c   :  { %v1118_v42 = vadd.f32 %v2194_v20, %v1117_v39  ;;  %v1446_v43 = vpop.f32.mrb[30].mxu0 }
 0x35d   :  { %1210 = vst [vmem:[%s2331_s7 + $0x70] sm:$0xff] %v1126_v34  ;;  %v1129_v45 = vadd.f32 %v1446_v43, %v2194_v20  ;;  %v1120_v46 = vpop.f32.mrb[31].mxu0 }
 0x35e   :  { %1208 = vst [vmem:[%s2331_s7 + $0x60] sm:$0xff] %v1118_v42  ;;  %v1121_v48 = vadd.f32 %v2194_v20, %v1120_v46 }
 0x35f   :  { %1211 = vst [vmem:[%s2331_s7 + $0x78] sm:$0xff] %v1129_v45 }
 0x360   :  { %1209 = vst [vmem:[%s2331_s7 + $0x68] sm:$0xff] %v1121_v48 }
 0x362   :  { %v1449_v49 = vpop.f32.mrb[32].mxu0 }
 0x363   :  { %v1142_v51 = vadd.f32 %v1449_v49, %v2194_v20  ;;  %v1133_v52 = vpop.f32.mrb[33].mxu0 }
 0x364   :  { %v1134_v54 = vadd.f32 %v2194_v20, %v1133_v52  ;;  %v1450_v55 = vpop.f32.mrb[34].mxu0 }
 0x365   :  { %1214 = vst [vmem:[%s2331_s7 + $0x90] sm:$0xff] %v1142_v51  ;;  %v1145_v61 = vadd.f32 %v1450_v55, %v2194_v20  ;;  %v1136_v63 = vpop.f32.mrb[35].mxu0 }
 0x366   :  { %1212 = vst [vmem:[%s2331_s7 + $0x80] sm:$0xff] %v1134_v54  ;;  %v1137_v0 = vadd.f32 %v2194_v20, %v1136_v63 }
 0x367   :  { %1215 = vst [vmem:[%s2331_s7 + $0x98] sm:$0xff] %v1145_v61 }
 0x368   :  { %1213 = vst [vmem:[%s2331_s7 + $0x88] sm:$0xff] %v1137_v0 }
 0x36a   :  { %v1453_v6 = vpop.f32.mrb[36].mxu0 }
 0x36b   :  { %v1158_v7 = vadd.f32 %v1453_v6, %v2194_v20  ;;  %v1149_v4 = vpop.f32.mrb[37].mxu0 }
 0x36c   :  { %v1150_v12 = vadd.f32 %v2194_v20, %v1149_v4  ;;  %v1454_v24 = vpop.f32.mrb[38].mxu0 }
 0x36d   :  { %1218 = vst [vmem:[%s2331_s7 + $0xb0] sm:$0xff] %v1158_v7  ;;  %v1161_v30 = vadd.f32 %v1454_v24, %v2194_v20  ;;  %v1152_v57 = vpop.f32.mrb[39].mxu0 }
 0x36e   :  { %1216 = vst [vmem:[%s2331_s7 + $0xa0] sm:$0xff] %v1150_v12  ;;  %v1153_v38 = vadd.f32 %v2194_v20, %v1152_v57 }
 0x36f   :  { %1219 = vst [vmem:[%s2331_s7 + $0xb8] sm:$0xff] %v1161_v30 }
 0x370   :  { %1217 = vst [vmem:[%s2331_s7 + $0xa8] sm:$0xff] %v1153_v38 }
 0x372   :  { %v1457_v58 = vpop.f32.mrb[40].mxu0 }
 0x373   :  { %v1174_v41 = vadd.f32 %v1457_v58, %v2194_v20  ;;  %v1165_v36 = vpop.f32.mrb[41].mxu0 }
 0x374   :  { %v1166_v17 = vadd.f32 %v2194_v20, %v1165_v36  ;;  %v1458_v44 = vpop.f32.mrb[42].mxu0 }
 0x375   :  { %1222 = vst [vmem:[%s2331_s7 + $0xd0] sm:$0xff] %v1174_v41  ;;  %v1177_v47 = vadd.f32 %v1458_v44, %v2194_v20  ;;  %v1168_v50 = vpop.f32.mrb[43].mxu0 }
 0x376   :  { %1220 = vst [vmem:[%s2331_s7 + $0xc0] sm:$0xff] %v1166_v17  ;;  %v1169_v53 = vadd.f32 %v2194_v20, %v1168_v50 }
 0x377   :  { %1223 = vst [vmem:[%s2331_s7 + $0xd8] sm:$0xff] %v1177_v47 }
 0x378   :  { %1221 = vst [vmem:[%s2331_s7 + $0xc8] sm:$0xff] %v1169_v53 }
 0x37a   :  { %v1461_v1 = vpop.f32.mrb[44].mxu0 }
 0x37b   :  { %v1190_v10 = vadd.f32 %v1461_v1, %v2194_v20  ;;  %v1181_v56 = vpop.f32.mrb[45].mxu0 }
 0x37c   :  { %v1182_v59 = vadd.f32 %v2194_v20, %v1181_v56  ;;  %v1462_v3 = vpop.f32.mrb[46].mxu0 }
 0x37d   :  { %1226 = vst [vmem:[%s2331_s7 + $0xf0] sm:$0xff] %v1190_v10  ;;  %v1193_v5 = vadd.f32 %v1462_v3, %v2194_v20  ;;  %v1184_v8 = vpop.f32.mrb[47].mxu0 }
 0x37e   :  { %1224 = vst [vmem:[%s2331_s7 + $0xe0] sm:$0xff] %v1182_v59  ;;  %v1185_v15 = vadd.f32 %v2194_v20, %v1184_v8 }
 0x37f   :  { %1227 = vst [vmem:[%s2331_s7 + $0xf8] sm:$0xff] %v1193_v5 }
 0x380   :  { %1225 = vst [vmem:[%s2331_s7 + $0xe8] sm:$0xff] %v1185_v15 }

</bundles_post_ra>
